<compile_context>
chip_gen: v7x
topology: tpu7x:2x2x1
jax: 0.10.0
libtpu: 0.0.40
codegen_flags: <defaults>
</compile_context>

<pallas_src>
import functools

import jax
import jax.numpy as jnp
from jax.experimental import pallas as pl
from jax.experimental.pallas import tpu as pltpu


def _round_up(x, m):
    return ((x + m - 1) // m) * m


def _softplus(x):
    return jnp.logaddexp(x, 0.0)


# ----------------------------------------------------------------------------
# Kernel 1: full-batch BatchNorm1d statistics (sum / sum-of-squares per feature)
# Accumulator outputs stay resident across the "arbitrary" row-tile axis.
# Zero-padded columns contribute nothing, so stats stay exact for the true N.
# ----------------------------------------------------------------------------
def stats_kernel(xT_ref, sum_ref, sq_ref):
    @pl.when(pl.program_id(0) == 0)
    def _():
        sum_ref[...] = jnp.zeros_like(sum_ref)
        sq_ref[...] = jnp.zeros_like(sq_ref)

    x = xT_ref[...]                                    # (F, TM), rows on lanes
    sum_ref[...] += jnp.sum(x, axis=1, keepdims=True)
    sq_ref[...] += jnp.sum(x * x, axis=1, keepdims=True)


# ----------------------------------------------------------------------------
# Kernel 2 (fused hot path): folded-BN MLP  +  both BinaryApproximators
# All per-row data has rows on the lane axis.
# ----------------------------------------------------------------------------
def fused_kernel(xT_ref, u1_ref, u2_ref, k_ref,
                 w1T_ref, b1_ref, w2T_ref, b2_ref, w3T_ref, b3_ref,
                 obs_ref, fake_ref, *, gamma, zeta):
    # MLP `g` (BatchNorm already folded into w1T/b1): Linear-ReLU-Linear-ReLU-Linear
    h1 = jnp.maximum(
        jnp.dot(w1T_ref[...], xT_ref[...], preferred_element_type=jnp.float32)
        + b1_ref[...], 0.0)                                         # (H, TM)
    h2 = jnp.maximum(
        jnp.dot(w2T_ref[...], h1, preferred_element_type=jnp.float32)
        + b2_ref[...], 0.0)                                         # (H, TM)
    ab = (jnp.dot(w3T_ref[...], h2, preferred_element_type=jnp.float32)
          + b3_ref[...])                                            # (2, TM)
    alpha = ab[0:1, :]                                              # (1, TM)
    beta = ab[1:2, :]                                               # (1, TM)

    u1 = u1_ref[...]                                                # (1, TM)
    u2 = u2_ref[...]
    k = k_ref[...]              # per-row exp(-log(softplus(a))/softplus(b))
    span = zeta - gamma

    # observation_scores = BinaryApproximator(noise1):
    #   sigmoid(log u - log(1-u) + c)  ==  u / (u + (1-u) * exp(-c)),  k = exp(-c)
    #   (u = 0 gives 0, u -> 1 gives 1: matches sigmoid(+-inf) of the reference)
    denom = jnp.maximum(u1 + (1.0 - u1) * k, 1e-30)
    s1 = u1 * pl.reciprocal(denom, approx=True)
    obs = jnp.clip(s1 * span + gamma, 0.0, 1.0)

    # relevance_understanding = BinaryApproximator_rel(noise2, alpha, beta):
    #   sigmoid((log u - log(1-u) + log(softplus(alpha))) / softplus(beta))
    #   (note: different formula from the obs path -- kept intentionally)
    logit = jnp.log(u2) - jnp.log(1.0 - u2) + jnp.log(_softplus(alpha))
    logit = logit * pl.reciprocal(_softplus(beta), approx=True)
    s2 = pl.reciprocal(1.0 + jnp.exp(-logit), approx=True)
    rel = jnp.clip(s2 * span + gamma, 0.0, 1.0)

    obs_ref[...] = obs
    fake_ref[...] = obs * rel


# ----------------------------------------------------------------------------
# Wrapper: layout plumbing + BN folding + the two pallas_calls
# ----------------------------------------------------------------------------
def generator_forward(params, relevance_scores, noise1, noise2,
                      gamma=-0.1, zeta=1.1, tile_rows=1024):
    B, R, F = relevance_scores.shape
    N = B * R
    H = params["w1"].shape[1]
    out_sz = params["w3"].shape[1]
    assert out_sz == 2, "g-net must emit (alpha, beta) pairs"

    # ---- layout plumbing: rows -> lanes, pad rows to a tile multiple --------
    TM = min(tile_rows, _round_up(N, 128))        # keep tiles modest for v7x VMEM
    Npad = _round_up(N, TM)
    ntiles = Npad // TM

    xT = relevance_scores.reshape(N, F).astype(jnp.float32).T       # (F, N)
    xT = jnp.pad(xT, ((0, 0), (0, Npad - N)))                       # zero cols

    # ---- pass 1: BatchNorm batch statistics over the FULL batch -------------
    feat_sum, feat_sq = pl.pallas_call(
        stats_kernel,
        out_shape=(jax.ShapeDtypeStruct((F, 1), jnp.float32),
                   jax.ShapeDtypeStruct((F, 1), jnp.float32)),
        grid_spec=pltpu.PrefetchScalarGridSpec(
            num_scalar_prefetch=0,
            grid=(ntiles,),
            in_specs=[pl.BlockSpec((F, TM), lambda i: (0, i))],
            out_specs=(pl.BlockSpec((F, 1), lambda i: (0, 0)),
                       pl.BlockSpec((F, 1), lambda i: (0, 0)))),
        compiler_params=pltpu.CompilerParams(
            dimension_semantics=("arbitrary",)),
    )(xT)

    # ---- fold BatchNorm1d (training mode, biased var, eps=1e-5) into Linear 1
    mean = (feat_sum / N).reshape(1, F)
    var = jnp.maximum(feat_sq.reshape(1, F) / N - mean * mean, 0.0)
    scale = params["bn_w"] * jax.lax.rsqrt(var + 1e-5)              # (1, F)
    shift = params["bn_b"] - mean * scale                           # (1, F)
    w1T = (params["w1"] * scale.reshape(F, 1)).T                    # (H, F)
    b1 = (params["b1"] + shift @ params["w1"]).reshape(H, 1)        # (H, 1)
    w2T = params["w2"].T                                            # (H, H)
    b2 = params["b2"].reshape(H, 1)
    w3T = params["w3"].T                                            # (2, H)
    b3 = params["b3"].reshape(out_sz, 1)

    # ---- per-rank constant for the observation BinaryApproximator -----------
    # k = exp(-log(softplus(alpha)) / softplus(beta)) on the (1, rank_cut)
    # parameters (O(R) transcendentals), broadcast to rows.
    c = jnp.log(_softplus(params["ba_alpha"])) / _softplus(params["ba_beta"])
    k = jnp.exp(-c)                                                 # (1, R)
    k_rows = jnp.broadcast_to(k, (B, R)).reshape(1, N)
    k_rows = jnp.pad(k_rows, ((0, 0), (0, Npad - N)), constant_values=1.0)

    u1 = jnp.pad(noise1.astype(jnp.float32).reshape(1, N),
                 ((0, 0), (0, Npad - N)), constant_values=0.5)
    u2 = jnp.pad(noise2.astype(jnp.float32).reshape(1, N),
                 ((0, 0), (0, Npad - N)), constant_values=0.5)

    row_spec = pl.BlockSpec((1, TM), lambda i: (0, i))
    pin = lambda shape: pl.BlockSpec(shape, lambda i: (0, 0))

    obs_pad, fake_pad = pl.pallas_call(
        functools.partial(fused_kernel, gamma=gamma, zeta=zeta),
        out_shape=(jax.ShapeDtypeStruct((1, Npad), jnp.float32),
                   jax.ShapeDtypeStruct((1, Npad), jnp.float32)),
        grid_spec=pltpu.PrefetchScalarGridSpec(
            num_scalar_prefetch=0,
            grid=(ntiles,),
            in_specs=[
                pl.BlockSpec((F, TM), lambda i: (0, i)),     # xT
                row_spec, row_spec, row_spec,                # u1, u2, k
                pin((H, F)), pin((H, 1)),                    # w1T, b1 (folded BN)
                pin((H, H)), pin((H, 1)),                    # w2T, b2
                pin((out_sz, H)), pin((out_sz, 1)),          # w3T, b3
            ],
            out_specs=(row_spec, row_spec)),
        compiler_params=pltpu.CompilerParams(
            dimension_semantics=("parallel",),   # v7x: shard row tiles over 2 TCs
            vmem_limit_bytes=32 * 1024 * 1024),
        cost_estimate=pl.CostEstimate(
            flops=2 * N * (F * H + H * H + H * out_sz) + 20 * N,
            transcendentals=8 * N,
            bytes_accessed=4 * (N * (F + 5)
                                + F * H + H * H + H * out_sz + 2 * H + out_sz)),
    )(xT, u1, u2, k_rows, w1T, b1, w2T, b2, w3T, b3)

    obs = obs_pad[0, :N].reshape(B, R)
    fake = fake_pad[0, :N].reshape(B, R)
    return obs, fake


def init_params(key, input_size, hidden_size, output_size, rank_cut):
    keys = jax.random.split(key, 5)

    def linear(k, fan_in, fan_out):
        bound = 1.0 / float(fan_in) ** 0.5
        kw, kb = jax.random.split(k)
        w = jax.random.uniform(kw, (fan_in, fan_out), jnp.float32, -bound, bound)
        b = jax.random.uniform(kb, (1, fan_out), jnp.float32, -bound, bound)
        return w, b

    w1, b1 = linear(keys[0], input_size, hidden_size)
    w2, b2 = linear(keys[1], hidden_size, hidden_size)
    w3, b3 = linear(keys[2], hidden_size, output_size)
    return dict(
        bn_w=jnp.ones((1, input_size), jnp.float32),
        bn_b=jnp.zeros((1, input_size), jnp.float32),
        w1=w1, b1=b1, w2=w2, b2=b2, w3=w3, b3=b3,
        # BinaryApproximator(rank_cut): alpha, beta ~ randn((1, rank_cut))
        ba_alpha=jax.random.normal(keys[3], (1, rank_cut), jnp.float32),
        ba_beta=jax.random.normal(keys[4], (1, rank_cut), jnp.float32),
    )


if __name__ == "__main__":
    # Small, forward-consistent shapes.
    batch, rank_cut = 2, 8                      # rank_size == rank_cut
    input_size, hidden_size, output_size = 4, 32, 2   # output_size=2 -> (alpha, beta)

    root = jax.random.PRNGKey(0)
    k_param, k_x, k_n1, k_n2 = jax.random.split(root, 4)

    params = init_params(k_param, input_size, hidden_size, output_size, rank_cut)
    relevance_scores = jax.random.normal(
        k_x, (batch, rank_cut, input_size), jnp.float32)
    # torch.rand equivalents (uniform [0, 1)), generated in the wrapper.
    noise1 = jax.random.uniform(k_n1, (batch, rank_cut), jnp.float32)
    noise2 = jax.random.uniform(k_n2, (batch, rank_cut), jnp.float32)

    obs, fake = jax.jit(generator_forward)(params, relevance_scores, noise1, noise2)
    jax.block_until_ready((obs, fake))

    assert obs.shape == (batch, rank_cut) and fake.shape == (batch, rank_cut)
    assert bool(jnp.all(jnp.isfinite(obs))) and bool(jnp.all(jnp.isfinite(fake)))
    assert bool(jnp.all((obs >= 0.0) & (obs <= 1.0)))
    assert bool(jnp.all((fake >= 0.0) & (fake <= 1.0)))
    print("KERNEL_OK")
</pallas_src>

<mosaic_0001>
module attributes {stable_mosaic.version = 11 : i64} {
  func.func @stats_kernel(%arg0: i32, %arg1: memref<4x128xf32, #tpu.memory_space<vmem>>, %arg2: memref<4x1xf32, #tpu.memory_space<vmem>>, %arg3: memref<4x1xf32, #tpu.memory_space<vmem>>) attributes {dimension_semantics = [#tpu.dimension_semantics<arbitrary>], iteration_bounds = array<i64: 1>, scalar_prefetch = 0 : i64, scratch_operands = 0 : i64, tpu.core_type = #tpu.core_type<tc>, window_params = [{transform_indices = @transform_0, window_bounds = array<i64: 4, 128>}, {pipeline_mode = #tpu.pipeline_mode<synchronous>, transform_indices = @transform_1, window_bounds = array<i64: 4, 1>}, {pipeline_mode = #tpu.pipeline_mode<synchronous>, transform_indices = @transform_2, window_bounds = array<i64: 4, 1>}]} {
    %c0_i32 = arith.constant 0 : i32
    %0 = arith.cmpi eq, %arg0, %c0_i32 : i32
    %1 = arith.extui %0 : i1 to i32
    %c0_i32_0 = arith.constant 0 : i32
    %2 = arith.cmpi ne, %1, %c0_i32_0 : i32
    scf.if %2 {
      %cst_11 = arith.constant 0.000000e+00 : f32
      %15 = vector.broadcast %cst_11 : f32 to vector<4x1xf32>
      %c0_12 = arith.constant 0 : index
      %c0_13 = arith.constant 0 : index
      %16 = vector.load %arg2[%c0_12, %c0_13] : memref<4x1xf32, #tpu.memory_space<vmem>>, vector<4x1xf32>
      tpu.vector_store %arg2[%c0_12, %c0_13], %15 {strides = array<i32>} : memref<4x1xf32, #tpu.memory_space<vmem>>, vector<4x1xf32>,
      %cst_14 = arith.constant 0.000000e+00 : f32
      %17 = vector.broadcast %cst_14 : f32 to vector<4x1xf32>
      %c0_15 = arith.constant 0 : index
      %c0_16 = arith.constant 0 : index
      %18 = vector.load %arg3[%c0_15, %c0_16] : memref<4x1xf32, #tpu.memory_space<vmem>>, vector<4x1xf32>
      tpu.vector_store %arg3[%c0_15, %c0_16], %17 {strides = array<i32>} : memref<4x1xf32, #tpu.memory_space<vmem>>, vector<4x1xf32>,
    } else {
    }
    %c0 = arith.constant 0 : index
    %c0_1 = arith.constant 0 : index
    %3 = vector.load %arg1[%c0, %c0_1] : memref<4x128xf32, #tpu.memory_space<vmem>>, vector<4x128xf32>
    %c0_2 = arith.constant 0 : index
    %c0_3 = arith.constant 0 : index
    %4 = vector.load %arg2[%c0_2, %c0_3] : memref<4x1xf32, #tpu.memory_space<vmem>>, vector<4x1xf32>
    %cst = arith.constant dense<0.000000e+00> : vector<4xf32>
    %5 = vector.multi_reduction <add>, %3, %cst [1] : vector<4x128xf32> to vector<4xf32>
    %6 = vector.shape_cast %5 : vector<4xf32> to vector<4x1xf32>
    %7 = arith.addf %4, %6 : vector<4x1xf32>
    %c0_4 = arith.constant 0 : index
    %c0_5 = arith.constant 0 : index
    %8 = vector.load %arg2[%c0_4, %c0_5] : memref<4x1xf32, #tpu.memory_space<vmem>>, vector<4x1xf32>
    tpu.vector_store %arg2[%c0_4, %c0_5], %7 {strides = array<i32>} : memref<4x1xf32, #tpu.memory_space<vmem>>, vector<4x1xf32>,
    %c0_6 = arith.constant 0 : index
    %c0_7 = arith.constant 0 : index
    %9 = vector.load %arg3[%c0_6, %c0_7] : memref<4x1xf32, #tpu.memory_space<vmem>>, vector<4x1xf32>
    %10 = arith.mulf %3, %3 : vector<4x128xf32>
    %cst_8 = arith.constant dense<0.000000e+00> : vector<4xf32>
    %11 = vector.multi_reduction <add>, %10, %cst_8 [1] : vector<4x128xf32> to vector<4xf32>
    %12 = vector.shape_cast %11 : vector<4xf32> to vector<4x1xf32>
    %13 = arith.addf %9, %12 : vector<4x1xf32>
    %c0_9 = arith.constant 0 : index
    %c0_10 = arith.constant 0 : index
    %14 = vector.load %arg3[%c0_9, %c0_10] : memref<4x1xf32, #tpu.memory_space<vmem>>, vector<4x1xf32>
    tpu.vector_store %arg3[%c0_9, %c0_10], %13 {strides = array<i32>} : memref<4x1xf32, #tpu.memory_space<vmem>>, vector<4x1xf32>,
    return
  }
  func.func @transform_0(%arg0: i32) -> (i32, i32) {
    %c0_i32 = arith.constant 0 : i32
    %c0_i32_0 = arith.constant 0 : i32
    return %c0_i32, %arg0 : i32, i32
  }
  func.func @transform_1(%arg0: i32) -> (i32, i32) {
    %c0_i32 = arith.constant 0 : i32
    %c0_i32_0 = arith.constant 0 : i32
    %c0_i32_1 = arith.constant 0 : i32
    return %c0_i32, %c0_i32_0 : i32, i32
  }
  func.func @transform_2(%arg0: i32) -> (i32, i32) {
    %c0_i32 = arith.constant 0 : i32
    %c0_i32_0 = arith.constant 0 : i32
    %c0_i32_1 = arith.constant 0 : i32
    return %c0_i32, %c0_i32_0 : i32, i32
  }
}

module attributes {stable_mosaic.version = 11 : i64} {
  func.func @fused_kernel(%arg0: i32, %arg1: memref<4x128xf32, #tpu.memory_space<vmem>>, %arg2: memref<1x128xf32, #tpu.memory_space<vmem>>, %arg3: memref<1x128xf32, #tpu.memory_space<vmem>>, %arg4: memref<1x128xf32, #tpu.memory_space<vmem>>, %arg5: memref<32x4xf32, #tpu.memory_space<vmem>>, %arg6: memref<32x1xf32, #tpu.memory_space<vmem>>, %arg7: memref<32x32xf32, #tpu.memory_space<vmem>>, %arg8: memref<32x1xf32, #tpu.memory_space<vmem>>, %arg9: memref<2x32xf32, #tpu.memory_space<vmem>>, %arg10: memref<2x1xf32, #tpu.memory_space<vmem>>, %arg11: memref<1x128xf32, #tpu.memory_space<vmem>>, %arg12: memref<1x128xf32, #tpu.memory_space<vmem>>) attributes {dimension_semantics = [#tpu.dimension_semantics<parallel>], iteration_bounds = array<i64: 1>, scalar_prefetch = 0 : i64, scratch_operands = 0 : i64, tpu.core_type = #tpu.core_type<tc>, window_params = [{transform_indices = @transform_0, window_bounds = array<i64: 4, 128>}, {transform_indices = @transform_1, window_bounds = array<i64: 1, 128>}, {transform_indices = @transform_2, window_bounds = array<i64: 1, 128>}, {transform_indices = @transform_3, window_bounds = array<i64: 1, 128>}, {pipeline_mode = #tpu.pipeline_mode<synchronous>, transform_indices = @transform_4, window_bounds = array<i64: 32, 4>}, {pipeline_mode = #tpu.pipeline_mode<synchronous>, transform_indices = @transform_5, window_bounds = array<i64: 32, 1>}, {pipeline_mode = #tpu.pipeline_mode<synchronous>, transform_indices = @transform_6, window_bounds = array<i64: 32, 32>}, {pipeline_mode = #tpu.pipeline_mode<synchronous>, transform_indices = @transform_7, window_bounds = array<i64: 32, 1>}, {pipeline_mode = #tpu.pipeline_mode<synchronous>, transform_indices = @transform_8, window_bounds = array<i64: 2, 32>}, {pipeline_mode = #tpu.pipeline_mode<synchronous>, transform_indices = @transform_9, window_bounds = array<i64: 2, 1>}, {transform_indices = @transform_10, window_bounds = array<i64: 1, 128>}, {transform_indices = @transform_11, window_bounds = array<i64: 1, 128>}]} {
    %c0 = arith.constant 0 : index
    %c0_0 = arith.constant 0 : index
    %0 = vector.load %arg5[%c0, %c0_0] : memref<32x4xf32, #tpu.memory_space<vmem>>, vector<32x4xf32>
    %c0_1 = arith.constant 0 : index
    %c0_2 = arith.constant 0 : index
    %1 = vector.load %arg1[%c0_1, %c0_2] : memref<4x128xf32, #tpu.memory_space<vmem>>, vector<4x128xf32>
    %cst = arith.constant dense<0.000000e+00> : vector<32x128xf32>
    %2 = tpu.matmul %0, %1, %cst {dimension_numbers = #tpu.dot_dimension_numbers<[1], [0], [0], [1], [0, 0, 1, 1], [], []>} : vector<32x4xf32>, vector<4x128xf32>, vector<32x128xf32> -> vector<32x128xf32>
    %c0_3 = arith.constant 0 : index
    %c0_4 = arith.constant 0 : index
    %3 = vector.load %arg6[%c0_3, %c0_4] : memref<32x1xf32, #tpu.memory_space<vmem>>, vector<32x1xf32>
    %4 = vector.broadcast %3 : vector<32x1xf32> to vector<32x128xf32>
    %5 = arith.addf %2, %4 : vector<32x128xf32>
    %cst_5 = arith.constant 0.000000e+00 : f32
    %6 = vector.broadcast %cst_5 : f32 to vector<32x128xf32>
    %7 = arith.maximumf %5, %6 : vector<32x128xf32>
    %c0_6 = arith.constant 0 : index
    %c0_7 = arith.constant 0 : index
    %8 = vector.load %arg7[%c0_6, %c0_7] : memref<32x32xf32, #tpu.memory_space<vmem>>, vector<32x32xf32>
    %cst_8 = arith.constant dense<0.000000e+00> : vector<32x128xf32>
    %9 = tpu.matmul %8, %7, %cst_8 {dimension_numbers = #tpu.dot_dimension_numbers<[1], [0], [0], [1], [0, 0, 1, 1], [], []>} : vector<32x32xf32>, vector<32x128xf32>, vector<32x128xf32> -> vector<32x128xf32>
    %c0_9 = arith.constant 0 : index
    %c0_10 = arith.constant 0 : index
    %10 = vector.load %arg8[%c0_9, %c0_10] : memref<32x1xf32, #tpu.memory_space<vmem>>, vector<32x1xf32>
    %11 = vector.broadcast %10 : vector<32x1xf32> to vector<32x128xf32>
    %12 = arith.addf %9, %11 : vector<32x128xf32>
    %cst_11 = arith.constant 0.000000e+00 : f32
    %13 = vector.broadcast %cst_11 : f32 to vector<32x128xf32>
    %14 = arith.maximumf %12, %13 : vector<32x128xf32>
    %c0_12 = arith.constant 0 : index
    %c0_13 = arith.constant 0 : index
    %15 = vector.load %arg9[%c0_12, %c0_13] : memref<2x32xf32, #tpu.memory_space<vmem>>, vector<2x32xf32>
    %cst_14 = arith.constant dense<0.000000e+00> : vector<2x128xf32>
    %16 = tpu.matmul %15, %14, %cst_14 {dimension_numbers = #tpu.dot_dimension_numbers<[1], [0], [0], [1], [0, 0, 1, 1], [], []>} : vector<2x32xf32>, vector<32x128xf32>, vector<2x128xf32> -> vector<2x128xf32>
    %c0_15 = arith.constant 0 : index
    %c0_16 = arith.constant 0 : index
    %17 = vector.load %arg10[%c0_15, %c0_16] : memref<2x1xf32, #tpu.memory_space<vmem>>, vector<2x1xf32>
    %18 = vector.broadcast %17 : vector<2x1xf32> to vector<2x128xf32>
    %19 = arith.addf %16, %18 : vector<2x128xf32>
    %20 = vector.extract_strided_slice %19 {offsets = [0, 0], sizes = [1, 128], strides = [1, 1]} : vector<2x128xf32> to vector<1x128xf32>
    %21 = vector.extract_strided_slice %19 {offsets = [1, 0], sizes = [1, 128], strides = [1, 1]} : vector<2x128xf32> to vector<1x128xf32>
    %c0_17 = arith.constant 0 : index
    %c0_18 = arith.constant 0 : index
    %22 = vector.load %arg2[%c0_17, %c0_18] : memref<1x128xf32, #tpu.memory_space<vmem>>, vector<1x128xf32>
    %c0_19 = arith.constant 0 : index
    %c0_20 = arith.constant 0 : index
    %23 = vector.load %arg3[%c0_19, %c0_20] : memref<1x128xf32, #tpu.memory_space<vmem>>, vector<1x128xf32>
    %c0_21 = arith.constant 0 : index
    %c0_22 = arith.constant 0 : index
    %24 = vector.load %arg4[%c0_21, %c0_22] : memref<1x128xf32, #tpu.memory_space<vmem>>, vector<1x128xf32>
    %cst_23 = arith.constant 1.000000e+00 : f32
    %25 = vector.broadcast %cst_23 : f32 to vector<1x128xf32>
    %26 = arith.subf %25, %22 : vector<1x128xf32>
    %27 = arith.mulf %26, %24 : vector<1x128xf32>
    %28 = arith.addf %22, %27 : vector<1x128xf32>
    %cst_24 = arith.constant 1.000000e-30 : f32
    %29 = vector.broadcast %cst_24 : f32 to vector<1x128xf32>
    %30 = arith.maximumf %28, %29 : vector<1x128xf32>
    %31 = tpu.reciprocal %30 {approx = true} : vector<1x128xf32> -> vector<1x128xf32>
    %32 = arith.mulf %22, %31 : vector<1x128xf32>
    %cst_25 = arith.constant 1.200000e+00 : f32
    %33 = vector.broadcast %cst_25 : f32 to vector<1x128xf32>
    %34 = arith.mulf %32, %33 : vector<1x128xf32>
    %cst_26 = arith.constant -1.000000e-01 : f32
    %35 = vector.broadcast %cst_26 : f32 to vector<1x128xf32>
    %36 = arith.addf %34, %35 : vector<1x128xf32>
    %cst_27 = arith.constant 0.000000e+00 : f32
    %cst_28 = arith.constant 1.000000e+00 : f32
    %37 = vector.broadcast %cst_27 : f32 to vector<1x128xf32>
    %38 = arith.maximumf %37, %36 : vector<1x128xf32>
    %39 = vector.broadcast %cst_28 : f32 to vector<1x128xf32>
    %40 = arith.minimumf %39, %38 : vector<1x128xf32>
    %41 = math.log %23 : vector<1x128xf32>
    %cst_29 = arith.constant 1.000000e+00 : f32
    %42 = vector.broadcast %cst_29 : f32 to vector<1x128xf32>
    %43 = arith.subf %42, %23 : vector<1x128xf32>
    %44 = math.log %43 : vector<1x128xf32>
    %45 = arith.subf %41, %44 : vector<1x128xf32>
    %cst_30 = arith.constant 0.000000e+00 : f32
    %46 = vector.broadcast %cst_30 : f32 to vector<1x128xf32>
    %47 = arith.maximumf %20, %46 : vector<1x128xf32>
    %48 = vector.broadcast %cst_30 : f32 to vector<1x128xf32>
    %49 = arith.subf %20, %48 : vector<1x128xf32>
    %50 = arith.cmpf one, %49, %49 : vector<1x128xf32>
    %51 = vector.broadcast %cst_30 : f32 to vector<1x128xf32>
    %52 = arith.addf %20, %51 : vector<1x128xf32>
    %53 = math.absf %49 : vector<1x128xf32>
    %cst_31 = arith.constant 0.000000e+00 : f32
    %54 = vector.broadcast %cst_31 : f32 to vector<1x128xf32>
    %55 = arith.subf %54, %53 : vector<1x128xf32>
    %56 = math.exp %55 : vector<1x128xf32>
    %57 = math.log1p %56 : vector<1x128xf32>
    %58 = arith.addf %47, %57 : vector<1x128xf32>
    %59 = arith.select %50, %52, %58 : vector<1x128xi1>, vector<1x128xf32>
    %60 = math.log %59 : vector<1x128xf32>
    %61 = arith.addf %45, %60 : vector<1x128xf32>
    %cst_32 = arith.constant 0.000000e+00 : f32
    %62 = vector.broadcast %cst_32 : f32 to vector<1x128xf32>
    %63 = arith.maximumf %21, %62 : vector<1x128xf32>
    %64 = vector.broadcast %cst_32 : f32 to vector<1x128xf32>
    %65 = arith.subf %21, %64 : vector<1x128xf32>
    %66 = arith.cmpf one, %65, %65 : vector<1x128xf32>
    %67 = vector.broadcast %cst_32 : f32 to vector<1x128xf32>
    %68 = arith.addf %21, %67 : vector<1x128xf32>
    %69 = math.absf %65 : vector<1x128xf32>
    %cst_33 = arith.constant 0.000000e+00 : f32
    %70 = vector.broadcast %cst_33 : f32 to vector<1x128xf32>
    %71 = arith.subf %70, %69 : vector<1x128xf32>
    %72 = math.exp %71 : vector<1x128xf32>
    %73 = math.log1p %72 : vector<1x128xf32>
    %74 = arith.addf %63, %73 : vector<1x128xf32>
    %75 = arith.select %66, %68, %74 : vector<1x128xi1>, vector<1x128xf32>
    %76 = tpu.reciprocal %75 {approx = true} : vector<1x128xf32> -> vector<1x128xf32>
    %77 = arith.mulf %61, %76 : vector<1x128xf32>
    %cst_34 = arith.constant 0.000000e+00 : f32
    %78 = vector.broadcast %cst_34 : f32 to vector<1x128xf32>
    %79 = arith.subf %78, %77 : vector<1x128xf32>
    %80 = math.exp %79 : vector<1x128xf32>
    %cst_35 = arith.constant 1.000000e+00 : f32
    %81 = vector.broadcast %cst_35 : f32 to vector<1x128xf32>
    %82 = arith.addf %81, %80 : vector<1x128xf32>
    %83 = tpu.reciprocal %82 {approx = true} : vector<1x128xf32> -> vector<1x128xf32>
    %cst_36 = arith.constant 1.200000e+00 : f32
    %84 = vector.broadcast %cst_36 : f32 to vector<1x128xf32>
    %85 = arith.mulf %83, %84 : vector<1x128xf32>
    %cst_37 = arith.constant -1.000000e-01 : f32
    %86 = vector.broadcast %cst_37 : f32 to vector<1x128xf32>
    %87 = arith.addf %85, %86 : vector<1x128xf32>
    %cst_38 = arith.constant 0.000000e+00 : f32
    %cst_39 = arith.constant 1.000000e+00 : f32
    %88 = vector.broadcast %cst_38 : f32 to vector<1x128xf32>
    %89 = arith.maximumf %88, %87 : vector<1x128xf32>
    %90 = vector.broadcast %cst_39 : f32 to vector<1x128xf32>
    %91 = arith.minimumf %90, %89 : vector<1x128xf32>
    %c0_40 = arith.constant 0 : index
    %c0_41 = arith.constant 0 : index
    %92 = vector.load %arg11[%c0_40, %c0_41] : memref<1x128xf32, #tpu.memory_space<vmem>>, vector<1x128xf32>
    tpu.vector_store %arg11[%c0_40, %c0_41], %40 {strides = array<i32>} : memref<1x128xf32, #tpu.memory_space<vmem>>, vector<1x128xf32>,
    %93 = arith.mulf %40, %91 : vector<1x128xf32>
    %c0_42 = arith.constant 0 : index
    %c0_43 = arith.constant 0 : index
    %94 = vector.load %arg12[%c0_42, %c0_43] : memref<1x128xf32, #tpu.memory_space<vmem>>, vector<1x128xf32>
    tpu.vector_store %arg12[%c0_42, %c0_43], %93 {strides = array<i32>} : memref<1x128xf32, #tpu.memory_space<vmem>>, vector<1x128xf32>,
    return
  }
  func.func @transform_0(%arg0: i32) -> (i32, i32) {
    %c0_i32 = arith.constant 0 : i32
    %c0_i32_0 = arith.constant 0 : i32
    return %c0_i32, %arg0 : i32, i32
  }
  func.func @transform_1(%arg0: i32) -> (i32, i32) {
    %c0_i32 = arith.constant 0 : i32
    %c0_i32_0 = arith.constant 0 : i32
    return %c0_i32, %arg0 : i32, i32
  }
  func.func @transform_2(%arg0: i32) -> (i32, i32) {
    %c0_i32 = arith.constant 0 : i32
    %c0_i32_0 = arith.constant 0 : i32
    return %c0_i32, %arg0 : i32, i32
  }
  func.func @transform_3(%arg0: i32) -> (i32, i32) {
    %c0_i32 = arith.constant 0 : i32
    %c0_i32_0 = arith.constant 0 : i32
    return %c0_i32, %arg0 : i32, i32
  }
  func.func @transform_4(%arg0: i32) -> (i32, i32) {
    %c0_i32 = arith.constant 0 : i32
    %c0_i32_0 = arith.constant 0 : i32
    %c0_i32_1 = arith.constant 0 : i32
    return %c0_i32, %c0_i32_0 : i32, i32
  }
  func.func @transform_5(%arg0: i32) -> (i32, i32) {
    %c0_i32 = arith.constant 0 : i32
    %c0_i32_0 = arith.constant 0 : i32
    %c0_i32_1 = arith.constant 0 : i32
    return %c0_i32, %c0_i32_0 : i32, i32
  }
  func.func @transform_6(%arg0: i32) -> (i32, i32) {
    %c0_i32 = arith.constant 0 : i32
    %c0_i32_0 = arith.constant 0 : i32
    %c0_i32_1 = arith.constant 0 : i32
    return %c0_i32, %c0_i32_0 : i32, i32
  }
  func.func @transform_7(%arg0: i32) -> (i32, i32) {
    %c0_i32 = arith.constant 0 : i32
    %c0_i32_0 = arith.constant 0 : i32
    %c0_i32_1 = arith.constant 0 : i32
    return %c0_i32, %c0_i32_0 : i32, i32
  }
  func.func @transform_8(%arg0: i32) -> (i32, i32) {
    %c0_i32 = arith.constant 0 : i32
    %c0_i32_0 = arith.constant 0 : i32
    %c0_i32_1 = arith.constant 0 : i32
    return %c0_i32, %c0_i32_0 : i32, i32
  }
  func.func @transform_9(%arg0: i32) -> (i32, i32) {
    %c0_i32 = arith.constant 0 : i32
    %c0_i32_0 = arith.constant 0 : i32
    %c0_i32_1 = arith.constant 0 : i32
    return %c0_i32, %c0_i32_0 : i32, i32
  }
  func.func @transform_10(%arg0: i32) -> (i32, i32) {
    %c0_i32 = arith.constant 0 : i32
    %c0_i32_0 = arith.constant 0 : i32
    return %c0_i32, %arg0 : i32, i32
  }
  func.func @transform_11(%arg0: i32) -> (i32, i32) {
    %c0_i32 = arith.constant 0 : i32
    %c0_i32_0 = arith.constant 0 : i32
    return %c0_i32, %arg0 : i32, i32
  }
}

</mosaic_0001>

<bundles_post_ra>
// kernel: squeeze.3
= control target key start
LH: loop header
LB: loop body
LE: loop exit
PB: predicated region body
PF: predicated region fallthrough
CT: control target
= control target key end

     0   :  { %s85_s0 = inlined_call_operand.vmem [shape: f32[16], index: 0, kind: input, shape index: {}]   ;;  %s86_s1 = inlined_call_operand.hbm [shape: f32[2,8], index: 1, kind: output, shape index: {}]  }
   0x1   :  { %v5_v0 = vld [vmem:[%s85_s0] sm:$0x1] }
   0x2   :  { %2 = vsyncpa [#allocation1], 0  ;;  %6 = vst [vmem:[#allocation3] sm:$0x1] %v5_v0  ;;  %vm8_vm0 = vcmask 64512   ;;  %s58_s0 = smov 120  }
   0x3   :  { %s59_s8 = smov [#allocation0]  }
   0x4   :  { %s26_s9 = sshll.u32 %s59_s8, 4  ;;  %s27_s9 = int_to_ptr.vmem [resolvable:$true] %s26_s9 }
   0x5   :  { %s34_s10 = scalar_lea.vmem %s27_s9, 32  ;;  %p39_p1 = scmp.lt.s32.totalorder %s27_s9, %s27_s9 }
   0x6   :  { %p35_p0 = scmp.ne.s32.totalorder %s27_s9, %s34_s10  ;;  %p40_p2 = scmp.lt.s32.totalorder %s34_s10, %s34_s10 }
   0x8   :  { %p41_p3 = por %p40_p2, %p39_p1 }
   0x9   :  { %v10_v1 = vld [vmem:[#allocation3] sm:$0x1]  }
   0xa   :  { %v7_v2 = vld [vmem:[#allocation3] sm:$0x1]   ;;  %11 = vrot.lane.b32.xlu0 %v10_v1, %s58_s0  ;;  %p42_p4 = pnand %p41_p3, %p35_p0 }
   0xb   :  { %9 = vst.msk [vmem:[#allocation2] sm:$0x1] %vm8_vm0, %v7_v2  }
  0x7c   :  { %v12_v3 = vpop.permute.xlu0 %11  }
  0x7d   :  { %15 = vst.msk [vmem:[#allocation2 + $0x1] sm:$0x1] %vm8_vm0, %v12_v3  }
  0x84   :  { %v19_v4 = vld [vmem:[#allocation2] sm:$0x3] }
  0x85   :  { %21 = vst [vmem:[#allocation0] sm:$0x3] %v19_v4 }
  0x86   :  { %45 = shalt.err (!%p42_p4)
}
  0x87   :  { %s46_s13 = scalar_lea.hbm %s86_s1, 32 }
  0x88   :  { %p47_p5 = scmp.ne.s32.totalorder %s86_s1, %s46_s13  ;;  %p50_p6 = scmp.lt.u32.totalorder %s46_s13, %s86_s1 }
  0x8a   :  { %p52_p7 = pnand %p50_p6, %p47_p5 }
  0x8c   :  { %55 = shalt.err (!%p52_p7)
}
  0x8d   :  { %29 = dma.vmem_to_hbm [thread:$0]  %s27_s9, 32, %s86_s1, [#allocation1]  }
  0x8e   :  { %56 = dma.done.wait [#allocation1], 32  }
  0x8f   :  { %57 = vsyncadd [#allocation1], 4294967264 }
  0x90   :  { %31 = vsyncpa [#allocation1], 1 }

// kernel: generator_forward.2
= control target key start
LH: loop header
LB: loop body
LE: loop exit
PB: predicated region body
PF: predicated region fallthrough
CT: control target
= control target key end

     0   :  { %vm19_vm0 = vcmask 1043456   ;;  %vm14_vm1 = vcmask 3072   ;;  %v42_v1 = vmov 0.0   ;;  %s83_s0 = inlined_call_operand.vmem [shape: f32[4,128], index: 0, kind: input, shape index: {}]   ;;  %s84_s1 = inlined_call_operand.vmem [shape: f32[4,1], index: 1, kind: output, shape index: {0}]   ;;  %s85_s2 = inlined_call_operand.vmem [shape: f32[4,1], index: 2, kind: output, shape index: {1}]  }
   0x1   :  { %v17_v0 = vld [vmem:[%s83_s0] sm:$0xf]  ;;  %15 = vst.msk [vmem:[%s84_s1] sm:$0xf] %vm14_vm1, %v42_v1  ;;  %16 = vst.msk [vmem:[%s85_s2] sm:$0xf] %vm14_vm1, %v42_v1 }
   0x2   :  { %v20_v2 = vsel %vm19_vm0, %v17_v0, 0.0  ;;  %v27_v3 = vmul.f32 %v17_v0, %v17_v0 }
   0x3   :  { %21 = vadd.xlane.f32.xlu0 %v20_v2 }
   0x4   :  { %v28_v4 = vsel %vm19_vm0, %v27_v3, 0.0 }
   0x7   :  { %29 = vadd.xlane.f32.xlu0 %v28_v4 }
   0x8   :  { %v18_v5 = vld [vmem:[%s84_s1] sm:$0xf] }
   0x9   :  { %v26_v8 = vld [vmem:[%s85_s2] sm:$0xf] }
  0x90   :  { %v22_v6 = vpop.xlane.xlu0 %21 }
  0x91   :  { %v23_v7 = vadd.f32 %v22_v6, %v18_v5 }
  0x93   :  { %25 = vst.msk [vmem:[%s84_s1] sm:$0xf] %vm14_vm1, %v23_v7 }
  0x94   :  { %v30_v9 = vpop.xlane.xlu0 %29 }
  0x95   :  { %v31_v10 = vadd.f32 %v30_v9, %v26_v8 }
  0x97   :  { %32 = vst.msk [vmem:[%s85_s2] sm:$0xf] %vm14_vm1, %v31_v10 }

// kernel: generator_forward.3
= control target key start
LH: loop header
LB: loop body
LE: loop exit
PB: predicated region body
PF: predicated region fallthrough
CT: control target
= control target key end

     0   :  { %vm79_vm0 = vcmask 1043456   ;;  %vm66_vm1 = vcmask 31744   ;;  %v561_v3 = vmov 0   ;;  %vm200_vm2 = vcmask 261120   ;;  %s711_s0 = inlined_call_operand.vmem [shape: f32[4,128], index: 0, kind: input, shape index: {}]   ;;  %s712_s4 = inlined_call_operand.vmem [shape: f32[32,4], index: 4, kind: input, shape index: {}]   ;;  %s713_s5 = inlined_call_operand.vmem [shape: f32[32,1], index: 5, kind: input, shape index: {}]   ;;  %s714_s7 = inlined_call_operand.vmem [shape: f32[32,1], index: 7, kind: input, shape index: {}]   ;;  %s715_s9 = inlined_call_operand.vmem [shape: f32[2,1], index: 9, kind: input, shape index: {}]   ;;  %s716_s6 = inlined_call_operand.vmem [shape: f32[32,32], index: 6, kind: input, shape index: {}]   ;;  %s717_s8 = inlined_call_operand.vmem [shape: f32[2,32], index: 8, kind: input, shape index: {}]   ;;  %s718_s1 = inlined_call_operand.vmem [shape: f32[1,128], index: 1, kind: input, shape index: {}]   ;;  %s719_s3 = inlined_call_operand.vmem [shape: f32[1,128], index: 3, kind: input, shape index: {}]   ;;  %s720_s10 = inlined_call_operand.vmem [shape: f32[1,128], index: 10, kind: output, shape index: {0}]   ;;  %s721_s2 = inlined_call_operand.vmem [shape: f32[1,128], index: 2, kind: input, shape index: {}]   ;;  %s722_s11 = inlined_call_operand.vmem [shape: f32[1,128], index: 11, kind: output, shape index: {1}]  }
   0x1   :  { %v41_v0 = vld [vmem:[%s711_s0] sm:$0xf]  ;;  %v38_v2 = vld [vmem:[%s712_s4 + $0x8] sm:$0xff]  ;;  %541 = vset.pattern.permute.xlu0 %v561_v3  ;;  %542 = vset.pattern.permute.xlu1 %v561_v3  ;;  %v39_v4 = vld [vmem:[%s712_s4 + $0x10] sm:$0xff]  ;;  %v562_v37 = vmov 0.0|0.0   ;;  %vm563_vm3 = vmmov 0  }
   0x2   :  { %v37_v1 = vld [vmem:[%s712_s4] sm:$0xff]  ;;  %489 = vmatprep.subr.msk.mxu0 %vm79_vm0, %v41_v0  ;;  %v44_v6 = vld [vmem:[%s713_s5 + $0x10] sm:$0xff]  ;;  %v43_v7 = vld [vmem:[%s713_s5 + $0x8] sm:$0xff]  ;;  %v564_v38 = vmov 0.0  }
   0x3   :  { %491 = vmatprep.mubr.msk.f32.mxu0 %vm66_vm1, %v37_v1  ;;  %v42_v5 = vld [vmem:[%s713_s5] sm:$0xff]  ;;  %490 = vmatpush3.msk.msra.mxu0 %vm79_vm0, %v41_v0  ;;  %v40_v8 = vld [vmem:[%s712_s4 + $0x18] sm:$0xff]  ;;  %v177_v11 = vld [vmem:[%s714_s7 + $0x8] sm:$0xff] }
   0x4   :  { %48 = vperm.xlu0 %541, %v42_v5   ;;  %492 = vmatmul.mubr.msk.f32.vlgmr.msra.gmra.mrb[0].mxu0 %vm66_vm1, %v38_v2  ;;  %v45_v9 = vld [vmem:[%s713_s5 + $0x18] sm:$0xff]  ;;  %v176_v10 = vld [vmem:[%s714_s7] sm:$0xff]  ;;  %v178_v12 = vld [vmem:[%s714_s7 + $0x10] sm:$0xff] }
   0x5   :  { %58 = vperm.xlu1 %542, %v44_v6   ;;  %494 = vmatprep.mubr.msk.f32.mxu0 %vm66_vm1, %v39_v4  ;;  %v179_v13 = vld [vmem:[%s714_s7 + $0x18] sm:$0xff]  ;;  %v303_v14 = vld [vmem:[%s715_s9] sm:$0x3]  ;;  %v173_v34 = vld [vmem:[%s716_s6 + $0x8] sm:$0xff] }
   0x6   :  { %v172_v15 = vld [vmem:[%s716_s6] sm:$0xff]  ;;  %v174_v35 = vld [vmem:[%s716_s6 + $0x10] sm:$0xff]  ;;  %v175_v36 = vld [vmem:[%s716_s6 + $0x18] sm:$0xff]  ;;  %530 = vmatprep.subr.bf16.mxu0 %v562_v37 }
   0x7   :  { %505 = vmatprep.mubr.msk.f32.mxu1 %vm200_vm2, %v172_v15  ;;  %v302_v57 = vld [vmem:[%s717_s8] sm:$0x3] }
   0x8   :  { %53 = vperm.xlu0 %541, %v43_v7   ;;  %495 = vmatmul.mubr.msk.f32.gmra.mrb[2].mxu0 %vm66_vm1, %v40_v8  ;;  %v382_v58 = vld [vmem:[%s718_s1] sm:$0x1] }
   0x9   :  { %63 = vperm.xlu1 %542, %v45_v9   ;;  %519 = vmatprep.mubr.msk.f32.mxu0 %vm563_vm3, %v564_v38  ;;  %v384_v59 = vld [vmem:[%s719_s3] sm:$0x1]  ;;  %v385_v60 = vsub.f32 1.0, %v382_v58 }
   0xb   :  { %v386_v61 = vmul.f32 %v385_v60, %v384_v59 }
   0xc   :  { %182 = vperm.xlu0 %541, %v176_v10  }
   0xd   :  { %187 = vperm.xlu1 %542, %v177_v11   ;;  %v387_v62 = vadd.f32 %v386_v61, %v382_v58 }
   0xf   :  { %v388_v63 = vmax.f32 %v387_v62, 1e-30 }
  0x10   :  { %192 = vperm.xlu0 %541, %v178_v12  }
  0x11   :  { %197 = vperm.xlu1 %542, %v179_v13   ;;  %543 = vrcp.f32 %v388_v63 }
  0x14   :  { %306 = vperm.xlu0 %541, %v303_v14  }
  0x1b   :  { %v544_v0 = vpop.eup %543 }
  0x1c   :  { %v390_v1 = vmul.f32 %v544_v0, %v382_v58 }
  0x1e   :  { %v391_v2 = vmul.f32 1.2, %v390_v1 }
  0x20   :  { %v392_v3 = vadd.f32 -0.1, %v391_v2 }
  0x22   :  { %v393_v4 = vmax.f32 %v392_v3, 0.0 }
  0x24   :  { %v698_v5 = vmin.f32 %v393_v4, 1.0 }
  0x26   :  { %450 = vst [vmem:[%s720_s10] sm:$0x1] %v698_v5 }
  0x83   :  { %v49_v16 = vpop.permute.xlu0 %48 }
  0x84   :  { %v59_v17 = vpop.permute.xlu1 %58 }
  0x87   :  { %v54_v18 = vpop.permute.xlu0 %53 }
  0x88   :  { %v64_v24 = vpop.permute.xlu1 %63 }
  0x8b   :  { %v183_v40 = vpop.permute.xlu0 %182 }
  0x8c   :  { %v188_v39 = vpop.permute.xlu1 %187 }
  0x8f   :  { %v193_v49 = vpop.permute.xlu0 %192 }
  0x90   :  { %v198_v46 = vpop.permute.xlu1 %197 }
  0x93   :  { %v307_v6 = vpop.permute.xlu0 %306 }
  0xd7   :  { %v493_v19 = vpop.f32.mrb[0].mxu0 }
  0xd8   :  { %v155_v20 = vadd.f32 %v493_v19, %v54_v18  ;;  %v149_v21 = vpop.f32.mrb[1].mxu0 }
  0xd9   :  { %v150_v22 = vadd.f32 %v149_v21, %v49_v16  ;;  %v383_v16 = vld [vmem:[%s721_s2] sm:$0x1] }
  0xda   :  { %v169_v23 = vmax.f32 %v155_v20, 0.0  ;;  %v397_v18 = vsub.f32 1.0, %v383_v16 }
  0xdb   :  { %v168_v25 = vmax.f32 %v150_v22, 0.0  ;;  %v496_v26 = vpop.f32.mrb[2].mxu0 }
  0xdc   :  { %v165_v27 = vadd.f32 %v496_v26, %v64_v24  ;;  %v159_v28 = vpop.f32.mrb[3].mxu0 }
  0xdd   :  { %v160_v29 = vadd.f32 %v159_v28, %v59_v17  ;;  %v522_v30 = vpack.c.bf16 %v169_v23, %v168_v25 }
  0xde   :  { %v171_v31 = vmax.f32 %v165_v27, 0.0  ;;  %v565_v27 = vmov 1966171168  }
  0xdf   :  { %v170_v32 = vmax.f32 %v160_v29, 0.0  ;;  %523 = vmatprep.subr.bf16.mxu1 %v522_v30  ;;  %v425_v28 = vunpack.c.l.s4 %v565_v27  ;;  %v427_v29 = vlaneseq }
  0xe0   :  { %525 = vmatpush3.bf16.msra.mxu1 %v522_v30 }
  0xe1   :  { %v526_v33 = vpack.c.bf16 %v171_v31, %v170_v32  ;;  %v426_v31 = vunpack.c.0.s8 %v425_v28  ;;  %v428_v32 = vshrl.u32 %v427_v29, 7 }
  0xe3   :  { %527 = vmatprep.subr.bf16.mxu1 %v526_v33 }
  0xe4   :  { %529 = vmatpush3.bf16.msra.mxu1 %v526_v33 }
  0xe7   :  { %506 = vmatmul.mubr.msk.f32.vlgmr.msra.gmra.mrb[0].mxu1 %vm200_vm2, %v173_v34 }
  0xe8   :  { %508 = vmatprep.mubr.msk.f32.mxu1 %vm200_vm2, %v174_v35 }
  0xeb   :  { %509 = vmatmul.mubr.msk.f32.gmra.mrb[2].mxu1 %vm200_vm2, %v175_v36  ;;  %v429_v36 = vsub.s32 %v426_v31, %v428_v32 }
 0x1ba   :  { %v507_v41 = vpop.f32.mrb[0].mxu1 }
 0x1bb   :  { %v285_v42 = vadd.f32 %v507_v41, %v188_v39  ;;  %v279_v43 = vpop.f32.mrb[1].mxu1 }
 0x1bc   :  { %v280_v44 = vadd.f32 %v279_v43, %v183_v40 }
 0x1bd   :  { %v299_v45 = vmax.f32 %v285_v42, 0.0 }
 0x1be   :  { %v298_v47 = vmax.f32 %v280_v44, 0.0  ;;  %v510_v48 = vpop.f32.mrb[2].mxu1 }
 0x1bf   :  { %v295_v50 = vadd.f32 %v510_v48, %v198_v46  ;;  %v289_v51 = vpop.f32.mrb[3].mxu1 }
 0x1c0   :  { %v531_v52 = vpack.c.bf16 %v299_v45, %v298_v47  ;;  %v290_v53 = vadd.f32 %v289_v51, %v193_v49 }
 0x1c1   :  { %v301_v54 = vmax.f32 %v295_v50, 0.0 }
 0x1c2   :  { %v300_v55 = vmax.f32 %v290_v53, 0.0  ;;  %532 = vmatpush3.bf16.msra.mxu0 %v531_v52 }
 0x1c3   :  { %533 = vmatprep.subr.bf16.mxu0 %v562_v37 }
 0x1c4   :  { %v534_v56 = vpack.c.bf16 %v301_v54, %v300_v55 }
 0x1c6   :  { %535 = vmatpush3.bf16.msra.mxu0 %v534_v56 }
 0x1c9   :  { %520 = vmatmul.mubr.msk.f32.vlgmr.msra.gmra.mrb[4].mxu0 %vm200_vm2, %v302_v57 }
 0x29c   :  { %v378_v7 = vpop.f32.mrb[4].mxu0 }
 0x29d   :  { %v379_v8 = vadd.f32 %v378_v7, %v307_v6  ;;  %v521_v9 = vpop.f32.mrb[5].mxu0 }
 0x29f   :  { %v404_v10 = vand.u32 2147483647, %v379_v8  ;;  %v401_v23 = vmax.f32 %v379_v8, 0.0  ;;  %vm402_vm5 = vcmp.ne.f32.partialorder %v379_v8, %v379_v8 }
 0x2a1   :  { %v405_v11 = vsub.f32 0.0, %v404_v10 }
 0x2a3   :  { %v406_v12 = vmul.f32 1.442695, %v405_v11 }
 0x2a5   :  { %545 = vpow2.f32 %v406_v12 }
 0x2af   :  { %v546_v13 = vpop.eup %545 }
 0x2b0   :  { %v408_v14 = vadd.f32 1.0, %v546_v13  ;;  %v411_v15 = vmul.f32 -0.5, %v546_v13  ;;  %v414_v19 = vand.u32 2147483647, %v546_v13 }
 0x2b2   :  { %547 = vlog2.f32 %v408_v14  ;;  %v412_v17 = vadd.f32 1.0, %v411_v15  ;;  %vm415_vm4 = vcmp.lt.f32.partialorder %v414_v19, 0.0004427343 }
 0x2b3   :  { %549 = vlog2.f32 %v383_v16 }
 0x2b4   :  { %v413_v22 = vmul.f32 %v546_v13, %v412_v17  ;;  %551 = vlog2.f32 %v397_v18 }
 0x2bc   :  { %v548_v20 = vpop.eup %547 }
 0x2bd   :  { %v410_v21 = vmul.f32 0.6931472, %v548_v20  ;;  %v550_v30 = vpop.eup %549 }
 0x2be   :  { %v552_v33 = vpop.eup %551  ;;  %v396_v34 = vmul.f32 0.6931472, %v550_v30 }
 0x2bf   :  { %v416_v24 = vsel %vm415_vm4, %v413_v22, %v410_v21  ;;  %v399_v35 = vmul.f32 0.6931472, %v552_v33 }
 0x2c0   :  { %v417_v25 = vadd.f32 %v416_v24, %v401_v23 }
 0x2c1   :  { %v400_v39 = vsub.f32 %v396_v34, %v399_v35 }
 0x2c2   :  { %v418_v26 = vsel %vm402_vm5, %v379_v8, %v417_v25 }
 0x2c3   :  { %553 = vlog2.f32 %v418_v26 }
 0x2c4   :  { %555 = vrcp.f32 %v418_v26 }
 0x2cd   :  { %v554_v37 = vpop.eup %553 }
 0x2ce   :  { %v556_v38 = vpop.eup %555  ;;  %v420_v40 = vmul.f32 0.6931472, %v554_v37 }
 0x2cf   :  { %v430_v41 = vrot.slane %v556_v38, %v429_v36 }
 0x2d0   :  { %v421_v43 = vadd.f32 %v420_v40, %v400_v39 }
 0x2d1   :  { %v431_v42 = vcombine.high %v430_v41, %v430_v41 }
 0x2d3   :  { %v438_v44 = vrot.slane %v431_v42, %v429_v36 }
 0x2d5   :  { %v440_v45 = vmul.f32 %v438_v44, %v421_v43 }
 0x2d7   :  { %v441_v46 = vsub.f32 0.0, %v440_v45 }
 0x2d9   :  { %v442_v47 = vmul.f32 1.442695, %v441_v46 }
 0x2db   :  { %557 = vpow2.f32 %v442_v47 }
 0x2e5   :  { %v558_v48 = vpop.eup %557 }
 0x2e6   :  { %v444_v49 = vadd.f32 1.0, %v558_v48 }
 0x2e8   :  { %559 = vrcp.f32 %v444_v49 }
 0x2f2   :  { %v560_v50 = vpop.eup %559 }
 0x2f3   :  { %v446_v51 = vmul.f32 1.2, %v560_v50 }
 0x2f5   :  { %v447_v52 = vadd.f32 -0.1, %v446_v51 }
 0x2f7   :  { %v448_v53 = vmax.f32 %v447_v52, 0.0 }
 0x2f9   :  { %v449_v54 = vmin.f32 %v448_v53, 1.0 }
 0x2fb   :  { %v451_v55 = vmul.f32 %v449_v54, %v698_v5 }
 0x2fd   :  { %452 = vst [vmem:[%s722_s11] sm:$0x1] %v451_v55 }

</bundles_post_ra>
